<compile_context>
chip_gen: v7x
topology: tpu7x:2x2x1
jax: 0.10.0
libtpu: 0.0.40
codegen_flags: <defaults>
</compile_context>

<pallas_src>
import jax
import jax.numpy as jnp
from jax.experimental import pallas as pl
from jax.experimental.pallas import tpu as pltpu

INPUT_DIM = 6
HID = 64
OUT_DIM = 3
NUM_EMO = 6
NHEAD = 8
HEAD_DIM = HID // NHEAD
EPS = 1e-5          # PyTorch LayerNorm default eps

EMO_PAD = 8         # emotion input padded 6 -> 8 lanes (bf16)
OUT_PAD = 128       # lane-dense output / padded-logit width
MAX_TB = 1024       # batch tile cap (sweepable 1024-2048; ~3 MB VMEM at 2048)
VMEM_LIMIT = 32 * 1024 * 1024   # explicit scoped-VMEM limit (v5e default is 16 MiB)

# Column offsets inside the (64, 640) bf16 weight slab — each matrix starts on a
# 128-lane boundary so slab slices are free views (no lane relayout before MXU).
C_MW2, C_WFUS, C_FW2, C_DW1, C_DW2 = 0, 128, 256, 384, 512
W_COLS = C_DW2 + OUT_PAD                    # 640

# Row indices inside the (16, 64) f32 bias / LayerNorm slab.
(R_MB1, R_MG1, R_MBT1,
 R_MB2, R_MG2, R_MBT2,
 R_BFUS, R_FG1, R_FBT1,
 R_FB2, R_FG2, R_FBT2,
 R_DB1, R_DG1, R_DBT1) = range(15)
NVEC = 15
NVEC_PAD = 16


def _round_up(n, m):
    return ((n + m - 1) // m) * m


# ----------------------------------------------------------------------------
# Kernel
# ----------------------------------------------------------------------------
def decision_kernel(emo_ref, mw1_ref, w_ref, v_ref, b2_ref, out_ref):
    vs = v_ref[...]                             # (16, 64) f32 bias/gamma/beta rows

    def row(i):                                 # (1, 64) broadcastable row
        return vs[i:i + 1, :]

    def mm(a, col, width=HID):                  # bf16 matmul, f32 accumulate
        w = w_ref[:, col:col + width]           # 128-lane-aligned bf16 slab slice
        return jnp.dot(a.astype(jnp.bfloat16), w,
                       preferred_element_type=jnp.float32)

    def ln(h, gi, bi, inv_n=None):
        # One-pass LayerNorm: var = E[h^2] - mu^2 (clamped at 0 for safety).
        # inv_n != None: padded lanes of h are exactly 0, so plain sums over all
        # 64 lanes divided by the real width give the correct masked statistics.
        if inv_n is None:
            mu = jnp.mean(h, axis=-1, keepdims=True)
            ex2 = jnp.mean(h * h, axis=-1, keepdims=True)
        else:
            mu = jnp.sum(h, axis=-1, keepdims=True) * inv_n
            ex2 = jnp.sum(h * h, axis=-1, keepdims=True) * inv_n
        var = jnp.maximum(ex2 - mu * mu, 0.0)
        return (h - mu) * jax.lax.rsqrt(var + EPS) * row(gi) + row(bi)

    # --- emotion encoder -----------------------------------------------------
    # (TB, 8) bf16 @ (8, 64) bf16 -> (TB, 64) f32; input lanes 6..7 are zero.
    h = jnp.dot(emo_ref[...], mw1_ref[...],
                preferred_element_type=jnp.float32) + row(R_MB1)
    h = jnp.maximum(ln(h, R_MG1, R_MBT1), 0.0)  # Dropout: identity in eval mode
    h = mm(h, C_MW2) + row(R_MB2)
    emof = jnp.maximum(ln(h, R_MG2, R_MBT2), 0.0)

    # --- attention (folded out_proj∘v_proj) + fusion layer 1 -----------------
    h = mm(emof, C_WFUS) + row(R_BFUS)
    h = jnp.maximum(ln(h, R_FG1, R_FBT1), 0.0)
    # --- fusion layer 2 ------------------------------------------------------
    h = mm(h, C_FW2) + row(R_FB2)
    fused = jnp.maximum(ln(h, R_FG2, R_FBT2), 0.0)

    # --- decision head layer 1 (real width 32; lanes 32..63 are exactly 0) ---
    h = mm(fused, C_DW1) + row(R_DB1)           # padded dW1 cols / db1 lanes = 0
    h = ln(h, R_DG1, R_DBT1, inv_n=1.0 / float(HID // 2))
    # Padded gamma/beta rows are zero -> lanes 32..63 stay exactly 0, and the
    # corresponding dW2 rows are zero-padded, so no further masking is needed.
    h = jnp.maximum(h, 0.0)

    # --- decision head layer 2 + softmax (lane-dense over 128 lanes) ---------
    logits = mm(h, C_DW2, OUT_PAD) + b2_ref[...]    # padded lanes biased -1e30
    m = jnp.max(logits, axis=-1, keepdims=True)
    e = jnp.exp(logits - m)
    out_ref[...] = e * pl.reciprocal(jnp.sum(e, axis=-1, keepdims=True),
                                     approx=True)


# ----------------------------------------------------------------------------
# Host-side wrapper
# ----------------------------------------------------------------------------
def decision_forward(x, emotion_repr, packed):
    """x is accepted for API parity with the PyTorch module; in eval mode the
    output provably does not depend on it (softmax over one key == 1, so the
    attention query -- and the env encoder feeding it -- is discarded)."""
    del x
    mw1_slab, w_slab, v_slab, b2_slab = packed
    B = emotion_repr.shape[0]

    # Big sublane-aligned batch tiles amortize per-step overhead; aim for >= 2
    # grid steps (when B > 8) so v7x's two TensorCores can split the batch.
    half = -(-B // 2)
    tb = min(MAX_TB, max(8, _round_up(half, 8)))
    b_pad = _round_up(max(B, tb), tb)

    emo_pad = jnp.zeros((b_pad, EMO_PAD), jnp.bfloat16).at[:B, :NUM_EMO].set(
        emotion_repr.astype(jnp.bfloat16))

    out = pl.pallas_call(
        decision_kernel,
        out_shape=jax.ShapeDtypeStruct((b_pad, OUT_PAD), jnp.float32),
        grid_spec=pltpu.PrefetchScalarGridSpec(
            num_scalar_prefetch=0,
            grid=(b_pad // tb,),
            in_specs=[
                pl.BlockSpec((tb, EMO_PAD), lambda i: (i, 0)),       # emotion block
                pl.BlockSpec((EMO_PAD, HID), lambda i: (0, 0)),      # mW1 (pinned)
                pl.BlockSpec((HID, W_COLS), lambda i: (0, 0)),       # weight slab (pinned)
                pl.BlockSpec((NVEC_PAD, HID), lambda i: (0, 0)),     # bias/LN slab (pinned)
                pl.BlockSpec((1, OUT_PAD), lambda i: (0, 0)),        # logit-bias row (pinned)
            ],
            out_specs=pl.BlockSpec((tb, OUT_PAD), lambda i: (i, 0)),
        ),
        compiler_params=pltpu.CompilerParams(
            dimension_semantics=("parallel",),
            vmem_limit_bytes=VMEM_LIMIT),
    )(emo_pad, mw1_slab, w_slab, v_slab, b2_slab)

    probs = out[:B, :OUT_DIM]
    # Head-averaged attention over a single key position is identically 1.
    attn_w = jnp.ones((B, 1, 1), jnp.float32)
    return probs, attn_w


def pack_params(P):
    """Fold eval-mode attention into fusion layer 1 and pack all parameters
    into 4 contiguous slabs (done once, outside the kernel)."""
    f32 = jnp.float32

    # fold: attended = emof @ (Wv@Wo) + (bv@Wo + bo);  then the concat-matmul
    # cat([attended, emof]) @ fW1 == emof @ Wfus + bfus.
    Wvo = P["Wv"] @ P["Wo"]
    bvo = P["bv"] @ P["Wo"] + P["bo"]
    fW1a, fW1b = P["fW1"][:HID], P["fW1"][HID:]
    Wfus = Wvo @ fW1a + fW1b
    bfus = bvo @ fW1a + P["fb1"]

    # (8, 64) bf16 first-layer weight; input rows 6..7 are zero.
    mw1_slab = jnp.zeros((EMO_PAD, HID), f32).at[:NUM_EMO, :].set(
        P["mW1"]).astype(jnp.bfloat16)

    # (64, 640) bf16 weight slab; every matrix starts on a 128-lane boundary.
    dW2p = jnp.zeros((HID, OUT_PAD), f32).at[:HID // 2, :OUT_DIM].set(P["dW2"])
    w = jnp.zeros((HID, W_COLS), f32)
    w = w.at[:, C_MW2:C_MW2 + HID].set(P["mW2"])
    w = w.at[:, C_WFUS:C_WFUS + HID].set(Wfus)
    w = w.at[:, C_FW2:C_FW2 + HID].set(P["fW2"])
    w = w.at[:, C_DW1:C_DW1 + HID // 2].set(P["dW1"])   # pad lanes stay exactly 0
    w = w.at[:, C_DW2:C_DW2 + OUT_PAD].set(dW2p)
    w_slab = w.astype(jnp.bfloat16)

    def pad_row(v):
        v = v.reshape(-1)
        return jnp.zeros((HID,), f32).at[:v.shape[0]].set(v)

    rows = [P["mb1"], P["mg1"], P["mbt1"],
            P["mb2"], P["mg2"], P["mbt2"],
            bfus, P["fg1"], P["fbt1"],
            P["fb2"], P["fg2"], P["fbt2"],
            P["db1"], P["dg1"], P["dbt1"]]
    v_slab = jnp.zeros((NVEC_PAD, HID), f32).at[:NVEC, :].set(
        jnp.stack([pad_row(r) for r in rows]))                    # (16, 64) f32

    b2_slab = jnp.full((1, OUT_PAD), -1e30, f32).at[0, :OUT_DIM].set(
        P["db2"].reshape(-1))                                     # (1, 128) f32
    return mw1_slab, w_slab, v_slab, b2_slab


# ----------------------------------------------------------------------------
# Parameter init (PyTorch-layout originals, weights stored (in, out)) and a
# faithful full-graph f32 reference (env encoder + real MHA + concat).
# ----------------------------------------------------------------------------
def init_params(key):
    keys = iter(jax.random.split(key, 64))

    def nrm(shape, scale):
        return scale * jax.random.normal(next(keys), shape, jnp.float32)

    def lin(din, dout):
        return nrm((din, dout), 0.2), nrm((1, dout), 0.05)

    def ln_p(d):
        return 1.0 + nrm((1, d), 0.1), nrm((1, d), 0.05)

    P = {}
    P["eW1"], P["eb1"] = lin(INPUT_DIM, HID); P["eg1"], P["ebt1"] = ln_p(HID)
    P["eW2"], P["eb2"] = lin(HID, HID);       P["eg2"], P["ebt2"] = ln_p(HID)
    P["mW1"], P["mb1"] = lin(NUM_EMO, HID);   P["mg1"], P["mbt1"] = ln_p(HID)
    P["mW2"], P["mb2"] = lin(HID, HID);       P["mg2"], P["mbt2"] = ln_p(HID)
    P["Wq"], P["bq"] = lin(HID, HID)
    P["Wk"], P["bk"] = lin(HID, HID)
    P["Wv"], P["bv"] = lin(HID, HID)
    P["Wo"], P["bo"] = lin(HID, HID)
    P["fW1"] = nrm((2 * HID, HID), 0.2); P["fb1"] = nrm((1, HID), 0.05)
    P["fg1"], P["fbt1"] = ln_p(HID)
    P["fW2"], P["fb2"] = lin(HID, HID);  P["fg2"], P["fbt2"] = ln_p(HID)
    P["dW1"], P["db1"] = lin(HID, HID // 2)
    P["dg1"], P["dbt1"] = ln_p(HID // 2)
    P["dW2"], P["db2"] = lin(HID // 2, OUT_DIM)
    return P


def reference(x, emo, P):
    B = x.shape[0]

    def ln(h, g, b):
        mu = h.mean(-1, keepdims=True)
        var = ((h - mu) ** 2).mean(-1, keepdims=True)
        return (h - mu) / jnp.sqrt(var + EPS) * g + b

    def enc(h, W1, b1, g1, bt1, W2, b2, g2, bt2):
        h = jnp.maximum(ln(h @ W1 + b1, g1, bt1), 0.0)
        return jnp.maximum(ln(h @ W2 + b2, g2, bt2), 0.0)

    env = enc(x, P["eW1"], P["eb1"], P["eg1"], P["ebt1"],
              P["eW2"], P["eb2"], P["eg2"], P["ebt2"])
    emof = enc(emo, P["mW1"], P["mb1"], P["mg1"], P["mbt1"],
               P["mW2"], P["mb2"], P["mg2"], P["mbt2"])

    # MultiheadAttention with q_len = kv_len = 1 (eval: dropout identity)
    q = env @ P["Wq"] + P["bq"]
    k = emof @ P["Wk"] + P["bk"]
    v = emof @ P["Wv"] + P["bv"]
    qh = q.reshape(B, NHEAD, HEAD_DIM)
    kh = k.reshape(B, NHEAD, HEAD_DIM)
    scores = (qh * kh).sum(-1, keepdims=True) / jnp.sqrt(float(HEAD_DIM))
    w = jax.nn.softmax(scores, axis=-1)               # softmax over 1 key -> ones
    attended = (w * v.reshape(B, NHEAD, HEAD_DIM)).reshape(B, HID) @ P["Wo"] + P["bo"]
    attn_weights = w.mean(axis=1).reshape(B, 1, 1)    # head-averaged

    comb = jnp.concatenate([attended, emof], axis=1)
    h = jnp.maximum(ln(comb @ P["fW1"] + P["fb1"], P["fg1"], P["fbt1"]), 0.0)
    fused = jnp.maximum(ln(h @ P["fW2"] + P["fb2"], P["fg2"], P["fbt2"]), 0.0)
    h = jnp.maximum(ln(fused @ P["dW1"] + P["db1"], P["dg1"], P["dbt1"]), 0.0)
    logits = h @ P["dW2"] + P["db2"]
    return jax.nn.softmax(logits, axis=-1), attn_weights


if __name__ == "__main__":
    key = jax.random.PRNGKey(0)
    kx, ke, kp = jax.random.split(key, 3)
    B = 2
    x = jax.random.normal(kx, (B, INPUT_DIM), jnp.float32)
    emotion_repr = jax.nn.softmax(
        jax.random.normal(ke, (B, NUM_EMO), jnp.float32), axis=-1)

    P = init_params(kp)
    packed = pack_params(P)

    probs, attn_w = decision_forward(x, emotion_repr, packed)
    jax.block_until_ready((probs, attn_w))

    ref_probs, ref_attn = reference(x, emotion_repr, P)
    assert probs.shape == (B, OUT_DIM) and attn_w.shape == (B, 1, 1)
    assert jnp.allclose(probs, ref_probs, atol=3e-2, rtol=3e-2)   # bf16 matmuls
    assert jnp.allclose(attn_w, ref_attn, atol=1e-6)
    assert jnp.allclose(jnp.sum(probs, axis=-1), 1.0, atol=2e-3)  # approx recip
    print("KERNEL_OK")
</pallas_src>

<mosaic_0001>
module attributes {stable_mosaic.version = 11 : i64} {
  func.func @decision_kernel(%arg0: i32, %arg1: memref<8x8xbf16, #tpu.memory_space<vmem>>, %arg2: memref<8x64xbf16, #tpu.memory_space<vmem>>, %arg3: memref<64x640xbf16, #tpu.memory_space<vmem>>, %arg4: memref<16x64xf32, #tpu.memory_space<vmem>>, %arg5: memref<1x128xf32, #tpu.memory_space<vmem>>, %arg6: memref<8x128xf32, #tpu.memory_space<vmem>>) attributes {dimension_semantics = [#tpu.dimension_semantics<parallel>], iteration_bounds = array<i64: 1>, scalar_prefetch = 0 : i64, scratch_operands = 0 : i64, tpu.core_type = #tpu.core_type<tc>, window_params = [{transform_indices = @transform_0, window_bounds = array<i64: 8, 8>}, {pipeline_mode = #tpu.pipeline_mode<synchronous>, transform_indices = @transform_1, window_bounds = array<i64: 8, 64>}, {pipeline_mode = #tpu.pipeline_mode<synchronous>, transform_indices = @transform_2, window_bounds = array<i64: 64, 640>}, {pipeline_mode = #tpu.pipeline_mode<synchronous>, transform_indices = @transform_3, window_bounds = array<i64: 16, 64>}, {pipeline_mode = #tpu.pipeline_mode<synchronous>, transform_indices = @transform_4, window_bounds = array<i64: 1, 128>}, {transform_indices = @transform_5, window_bounds = array<i64: 8, 128>}]} {
    %c0 = arith.constant 0 : index
    %c0_0 = arith.constant 0 : index
    %0 = vector.load %arg4[%c0, %c0_0] : memref<16x64xf32, #tpu.memory_space<vmem>>, vector<16x64xf32>
    %c0_1 = arith.constant 0 : index
    %c0_2 = arith.constant 0 : index
    %1 = vector.load %arg1[%c0_1, %c0_2] : memref<8x8xbf16, #tpu.memory_space<vmem>>, vector<8x8xbf16>
    %c0_3 = arith.constant 0 : index
    %c0_4 = arith.constant 0 : index
    %2 = vector.load %arg2[%c0_3, %c0_4] : memref<8x64xbf16, #tpu.memory_space<vmem>>, vector<8x64xbf16>
    %cst = arith.constant dense<0.000000e+00> : vector<8x64xf32>
    %3 = tpu.matmul %1, %2, %cst {dimension_numbers = #tpu.dot_dimension_numbers<[1], [0], [0], [1], [0, 0, 1, 1], [], []>} : vector<8x8xbf16>, vector<8x64xbf16>, vector<8x64xf32> -> vector<8x64xf32>
    %4 = vector.extract_strided_slice %0 {offsets = [0, 0], sizes = [1, 64], strides = [1, 1]} : vector<16x64xf32> to vector<1x64xf32>
    %5 = vector.broadcast %4 : vector<1x64xf32> to vector<8x64xf32>
    %6 = arith.addf %3, %5 : vector<8x64xf32>
    %cst_5 = arith.constant dense<0.000000e+00> : vector<8xf32>
    %7 = vector.multi_reduction <add>, %6, %cst_5 [1] : vector<8x64xf32> to vector<8xf32>
    %8 = vector.shape_cast %7 : vector<8xf32> to vector<8x1xf32>
    %cst_6 = arith.constant 6.400000e+01 : f32
    %9 = vector.broadcast %cst_6 : f32 to vector<8x1xf32>
    %10 = arith.divf %8, %9 : vector<8x1xf32>
    %11 = arith.mulf %6, %6 : vector<8x64xf32>
    %cst_7 = arith.constant dense<0.000000e+00> : vector<8xf32>
    %12 = vector.multi_reduction <add>, %11, %cst_7 [1] : vector<8x64xf32> to vector<8xf32>
    %13 = vector.shape_cast %12 : vector<8xf32> to vector<8x1xf32>
    %cst_8 = arith.constant 6.400000e+01 : f32
    %14 = vector.broadcast %cst_8 : f32 to vector<8x1xf32>
    %15 = arith.divf %13, %14 : vector<8x1xf32>
    %16 = arith.mulf %10, %10 : vector<8x1xf32>
    %17 = arith.subf %15, %16 : vector<8x1xf32>
    %cst_9 = arith.constant 0.000000e+00 : f32
    %18 = vector.broadcast %cst_9 : f32 to vector<8x1xf32>
    %19 = arith.maximumf %17, %18 : vector<8x1xf32>
    %20 = vector.broadcast %10 : vector<8x1xf32> to vector<8x64xf32>
    %21 = arith.subf %6, %20 : vector<8x64xf32>
    %cst_10 = arith.constant 9.99999974E-6 : f32
    %22 = vector.broadcast %cst_10 : f32 to vector<8x1xf32>
    %23 = arith.addf %19, %22 : vector<8x1xf32>
    %24 = math.rsqrt %23 : vector<8x1xf32>
    %25 = vector.broadcast %24 : vector<8x1xf32> to vector<8x64xf32>
    %26 = arith.mulf %21, %25 : vector<8x64xf32>
    %27 = vector.extract_strided_slice %0 {offsets = [1, 0], sizes = [1, 64], strides = [1, 1]} : vector<16x64xf32> to vector<1x64xf32>
    %28 = vector.broadcast %27 : vector<1x64xf32> to vector<8x64xf32>
    %29 = arith.mulf %26, %28 : vector<8x64xf32>
    %30 = vector.extract_strided_slice %0 {offsets = [2, 0], sizes = [1, 64], strides = [1, 1]} : vector<16x64xf32> to vector<1x64xf32>
    %31 = vector.broadcast %30 : vector<1x64xf32> to vector<8x64xf32>
    %32 = arith.addf %29, %31 : vector<8x64xf32>
    %cst_11 = arith.constant 0.000000e+00 : f32
    %33 = vector.broadcast %cst_11 : f32 to vector<8x64xf32>
    %34 = arith.maximumf %32, %33 : vector<8x64xf32>
    %c0_12 = arith.constant 0 : index
    %c0_13 = arith.constant 0 : index
    %35 = vector.load %arg3[%c0_12, %c0_13] : memref<64x640xbf16, #tpu.memory_space<vmem>>, vector<64x64xbf16>
    %36 = arith.truncf %34 : vector<8x64xf32> to vector<8x64xbf16>
    %cst_14 = arith.constant dense<0.000000e+00> : vector<8x64xf32>
    %37 = tpu.matmul %36, %35, %cst_14 {dimension_numbers = #tpu.dot_dimension_numbers<[1], [0], [0], [1], [0, 0, 1, 1], [], []>} : vector<8x64xbf16>, vector<64x64xbf16>, vector<8x64xf32> -> vector<8x64xf32>
    %38 = vector.extract_strided_slice %0 {offsets = [3, 0], sizes = [1, 64], strides = [1, 1]} : vector<16x64xf32> to vector<1x64xf32>
    %39 = vector.broadcast %38 : vector<1x64xf32> to vector<8x64xf32>
    %40 = arith.addf %37, %39 : vector<8x64xf32>
    %cst_15 = arith.constant dense<0.000000e+00> : vector<8xf32>
    %41 = vector.multi_reduction <add>, %40, %cst_15 [1] : vector<8x64xf32> to vector<8xf32>
    %42 = vector.shape_cast %41 : vector<8xf32> to vector<8x1xf32>
    %cst_16 = arith.constant 6.400000e+01 : f32
    %43 = vector.broadcast %cst_16 : f32 to vector<8x1xf32>
    %44 = arith.divf %42, %43 : vector<8x1xf32>
    %45 = arith.mulf %40, %40 : vector<8x64xf32>
    %cst_17 = arith.constant dense<0.000000e+00> : vector<8xf32>
    %46 = vector.multi_reduction <add>, %45, %cst_17 [1] : vector<8x64xf32> to vector<8xf32>
    %47 = vector.shape_cast %46 : vector<8xf32> to vector<8x1xf32>
    %cst_18 = arith.constant 6.400000e+01 : f32
    %48 = vector.broadcast %cst_18 : f32 to vector<8x1xf32>
    %49 = arith.divf %47, %48 : vector<8x1xf32>
    %50 = arith.mulf %44, %44 : vector<8x1xf32>
    %51 = arith.subf %49, %50 : vector<8x1xf32>
    %cst_19 = arith.constant 0.000000e+00 : f32
    %52 = vector.broadcast %cst_19 : f32 to vector<8x1xf32>
    %53 = arith.maximumf %51, %52 : vector<8x1xf32>
    %54 = vector.broadcast %44 : vector<8x1xf32> to vector<8x64xf32>
    %55 = arith.subf %40, %54 : vector<8x64xf32>
    %cst_20 = arith.constant 9.99999974E-6 : f32
    %56 = vector.broadcast %cst_20 : f32 to vector<8x1xf32>
    %57 = arith.addf %53, %56 : vector<8x1xf32>
    %58 = math.rsqrt %57 : vector<8x1xf32>
    %59 = vector.broadcast %58 : vector<8x1xf32> to vector<8x64xf32>
    %60 = arith.mulf %55, %59 : vector<8x64xf32>
    %61 = vector.extract_strided_slice %0 {offsets = [4, 0], sizes = [1, 64], strides = [1, 1]} : vector<16x64xf32> to vector<1x64xf32>
    %62 = vector.broadcast %61 : vector<1x64xf32> to vector<8x64xf32>
    %63 = arith.mulf %60, %62 : vector<8x64xf32>
    %64 = vector.extract_strided_slice %0 {offsets = [5, 0], sizes = [1, 64], strides = [1, 1]} : vector<16x64xf32> to vector<1x64xf32>
    %65 = vector.broadcast %64 : vector<1x64xf32> to vector<8x64xf32>
    %66 = arith.addf %63, %65 : vector<8x64xf32>
    %cst_21 = arith.constant 0.000000e+00 : f32
    %67 = vector.broadcast %cst_21 : f32 to vector<8x64xf32>
    %68 = arith.maximumf %66, %67 : vector<8x64xf32>
    %c0_22 = arith.constant 0 : index
    %c128 = arith.constant 128 : index
    %69 = vector.load %arg3[%c0_22, %c128] : memref<64x640xbf16, #tpu.memory_space<vmem>>, vector<64x64xbf16>
    %70 = arith.truncf %68 : vector<8x64xf32> to vector<8x64xbf16>
    %cst_23 = arith.constant dense<0.000000e+00> : vector<8x64xf32>
    %71 = tpu.matmul %70, %69, %cst_23 {dimension_numbers = #tpu.dot_dimension_numbers<[1], [0], [0], [1], [0, 0, 1, 1], [], []>} : vector<8x64xbf16>, vector<64x64xbf16>, vector<8x64xf32> -> vector<8x64xf32>
    %72 = vector.extract_strided_slice %0 {offsets = [6, 0], sizes = [1, 64], strides = [1, 1]} : vector<16x64xf32> to vector<1x64xf32>
    %73 = vector.broadcast %72 : vector<1x64xf32> to vector<8x64xf32>
    %74 = arith.addf %71, %73 : vector<8x64xf32>
    %cst_24 = arith.constant dense<0.000000e+00> : vector<8xf32>
    %75 = vector.multi_reduction <add>, %74, %cst_24 [1] : vector<8x64xf32> to vector<8xf32>
    %76 = vector.shape_cast %75 : vector<8xf32> to vector<8x1xf32>
    %cst_25 = arith.constant 6.400000e+01 : f32
    %77 = vector.broadcast %cst_25 : f32 to vector<8x1xf32>
    %78 = arith.divf %76, %77 : vector<8x1xf32>
    %79 = arith.mulf %74, %74 : vector<8x64xf32>
    %cst_26 = arith.constant dense<0.000000e+00> : vector<8xf32>
    %80 = vector.multi_reduction <add>, %79, %cst_26 [1] : vector<8x64xf32> to vector<8xf32>
    %81 = vector.shape_cast %80 : vector<8xf32> to vector<8x1xf32>
    %cst_27 = arith.constant 6.400000e+01 : f32
    %82 = vector.broadcast %cst_27 : f32 to vector<8x1xf32>
    %83 = arith.divf %81, %82 : vector<8x1xf32>
    %84 = arith.mulf %78, %78 : vector<8x1xf32>
    %85 = arith.subf %83, %84 : vector<8x1xf32>
    %cst_28 = arith.constant 0.000000e+00 : f32
    %86 = vector.broadcast %cst_28 : f32 to vector<8x1xf32>
    %87 = arith.maximumf %85, %86 : vector<8x1xf32>
    %88 = vector.broadcast %78 : vector<8x1xf32> to vector<8x64xf32>
    %89 = arith.subf %74, %88 : vector<8x64xf32>
    %cst_29 = arith.constant 9.99999974E-6 : f32
    %90 = vector.broadcast %cst_29 : f32 to vector<8x1xf32>
    %91 = arith.addf %87, %90 : vector<8x1xf32>
    %92 = math.rsqrt %91 : vector<8x1xf32>
    %93 = vector.broadcast %92 : vector<8x1xf32> to vector<8x64xf32>
    %94 = arith.mulf %89, %93 : vector<8x64xf32>
    %95 = vector.extract_strided_slice %0 {offsets = [7, 0], sizes = [1, 64], strides = [1, 1]} : vector<16x64xf32> to vector<1x64xf32>
    %96 = vector.broadcast %95 : vector<1x64xf32> to vector<8x64xf32>
    %97 = arith.mulf %94, %96 : vector<8x64xf32>
    %98 = vector.extract_strided_slice %0 {offsets = [8, 0], sizes = [1, 64], strides = [1, 1]} : vector<16x64xf32> to vector<1x64xf32>
    %99 = vector.broadcast %98 : vector<1x64xf32> to vector<8x64xf32>
    %100 = arith.addf %97, %99 : vector<8x64xf32>
    %cst_30 = arith.constant 0.000000e+00 : f32
    %101 = vector.broadcast %cst_30 : f32 to vector<8x64xf32>
    %102 = arith.maximumf %100, %101 : vector<8x64xf32>
    %c0_31 = arith.constant 0 : index
    %c256 = arith.constant 256 : index
    %103 = vector.load %arg3[%c0_31, %c256] : memref<64x640xbf16, #tpu.memory_space<vmem>>, vector<64x64xbf16>
    %104 = arith.truncf %102 : vector<8x64xf32> to vector<8x64xbf16>
    %cst_32 = arith.constant dense<0.000000e+00> : vector<8x64xf32>
    %105 = tpu.matmul %104, %103, %cst_32 {dimension_numbers = #tpu.dot_dimension_numbers<[1], [0], [0], [1], [0, 0, 1, 1], [], []>} : vector<8x64xbf16>, vector<64x64xbf16>, vector<8x64xf32> -> vector<8x64xf32>
    %106 = vector.extract_strided_slice %0 {offsets = [9, 0], sizes = [1, 64], strides = [1, 1]} : vector<16x64xf32> to vector<1x64xf32>
    %107 = vector.broadcast %106 : vector<1x64xf32> to vector<8x64xf32>
    %108 = arith.addf %105, %107 : vector<8x64xf32>
    %cst_33 = arith.constant dense<0.000000e+00> : vector<8xf32>
    %109 = vector.multi_reduction <add>, %108, %cst_33 [1] : vector<8x64xf32> to vector<8xf32>
    %110 = vector.shape_cast %109 : vector<8xf32> to vector<8x1xf32>
    %cst_34 = arith.constant 6.400000e+01 : f32
    %111 = vector.broadcast %cst_34 : f32 to vector<8x1xf32>
    %112 = arith.divf %110, %111 : vector<8x1xf32>
    %113 = arith.mulf %108, %108 : vector<8x64xf32>
    %cst_35 = arith.constant dense<0.000000e+00> : vector<8xf32>
    %114 = vector.multi_reduction <add>, %113, %cst_35 [1] : vector<8x64xf32> to vector<8xf32>
    %115 = vector.shape_cast %114 : vector<8xf32> to vector<8x1xf32>
    %cst_36 = arith.constant 6.400000e+01 : f32
    %116 = vector.broadcast %cst_36 : f32 to vector<8x1xf32>
    %117 = arith.divf %115, %116 : vector<8x1xf32>
    %118 = arith.mulf %112, %112 : vector<8x1xf32>
    %119 = arith.subf %117, %118 : vector<8x1xf32>
    %cst_37 = arith.constant 0.000000e+00 : f32
    %120 = vector.broadcast %cst_37 : f32 to vector<8x1xf32>
    %121 = arith.maximumf %119, %120 : vector<8x1xf32>
    %122 = vector.broadcast %112 : vector<8x1xf32> to vector<8x64xf32>
    %123 = arith.subf %108, %122 : vector<8x64xf32>
    %cst_38 = arith.constant 9.99999974E-6 : f32
    %124 = vector.broadcast %cst_38 : f32 to vector<8x1xf32>
    %125 = arith.addf %121, %124 : vector<8x1xf32>
    %126 = math.rsqrt %125 : vector<8x1xf32>
    %127 = vector.broadcast %126 : vector<8x1xf32> to vector<8x64xf32>
    %128 = arith.mulf %123, %127 : vector<8x64xf32>
    %129 = vector.extract_strided_slice %0 {offsets = [10, 0], sizes = [1, 64], strides = [1, 1]} : vector<16x64xf32> to vector<1x64xf32>
    %130 = vector.broadcast %129 : vector<1x64xf32> to vector<8x64xf32>
    %131 = arith.mulf %128, %130 : vector<8x64xf32>
    %132 = vector.extract_strided_slice %0 {offsets = [11, 0], sizes = [1, 64], strides = [1, 1]} : vector<16x64xf32> to vector<1x64xf32>
    %133 = vector.broadcast %132 : vector<1x64xf32> to vector<8x64xf32>
    %134 = arith.addf %131, %133 : vector<8x64xf32>
    %cst_39 = arith.constant 0.000000e+00 : f32
    %135 = vector.broadcast %cst_39 : f32 to vector<8x64xf32>
    %136 = arith.maximumf %134, %135 : vector<8x64xf32>
    %c0_40 = arith.constant 0 : index
    %c384 = arith.constant 384 : index
    %137 = vector.load %arg3[%c0_40, %c384] : memref<64x640xbf16, #tpu.memory_space<vmem>>, vector<64x64xbf16>
    %138 = arith.truncf %136 : vector<8x64xf32> to vector<8x64xbf16>
    %cst_41 = arith.constant dense<0.000000e+00> : vector<8x64xf32>
    %139 = tpu.matmul %138, %137, %cst_41 {dimension_numbers = #tpu.dot_dimension_numbers<[1], [0], [0], [1], [0, 0, 1, 1], [], []>} : vector<8x64xbf16>, vector<64x64xbf16>, vector<8x64xf32> -> vector<8x64xf32>
    %140 = vector.extract_strided_slice %0 {offsets = [12, 0], sizes = [1, 64], strides = [1, 1]} : vector<16x64xf32> to vector<1x64xf32>
    %141 = vector.broadcast %140 : vector<1x64xf32> to vector<8x64xf32>
    %142 = arith.addf %139, %141 : vector<8x64xf32>
    %cst_42 = arith.constant dense<0.000000e+00> : vector<8xf32>
    %143 = vector.multi_reduction <add>, %142, %cst_42 [1] : vector<8x64xf32> to vector<8xf32>
    %144 = vector.shape_cast %143 : vector<8xf32> to vector<8x1xf32>
    %cst_43 = arith.constant 3.125000e-02 : f32
    %145 = vector.broadcast %cst_43 : f32 to vector<8x1xf32>
    %146 = arith.mulf %144, %145 : vector<8x1xf32>
    %147 = arith.mulf %142, %142 : vector<8x64xf32>
    %cst_44 = arith.constant dense<0.000000e+00> : vector<8xf32>
    %148 = vector.multi_reduction <add>, %147, %cst_44 [1] : vector<8x64xf32> to vector<8xf32>
    %149 = vector.shape_cast %148 : vector<8xf32> to vector<8x1xf32>
    %cst_45 = arith.constant 3.125000e-02 : f32
    %150 = vector.broadcast %cst_45 : f32 to vector<8x1xf32>
    %151 = arith.mulf %149, %150 : vector<8x1xf32>
    %152 = arith.mulf %146, %146 : vector<8x1xf32>
    %153 = arith.subf %151, %152 : vector<8x1xf32>
    %cst_46 = arith.constant 0.000000e+00 : f32
    %154 = vector.broadcast %cst_46 : f32 to vector<8x1xf32>
    %155 = arith.maximumf %153, %154 : vector<8x1xf32>
    %156 = vector.broadcast %146 : vector<8x1xf32> to vector<8x64xf32>
    %157 = arith.subf %142, %156 : vector<8x64xf32>
    %cst_47 = arith.constant 9.99999974E-6 : f32
    %158 = vector.broadcast %cst_47 : f32 to vector<8x1xf32>
    %159 = arith.addf %155, %158 : vector<8x1xf32>
    %160 = math.rsqrt %159 : vector<8x1xf32>
    %161 = vector.broadcast %160 : vector<8x1xf32> to vector<8x64xf32>
    %162 = arith.mulf %157, %161 : vector<8x64xf32>
    %163 = vector.extract_strided_slice %0 {offsets = [13, 0], sizes = [1, 64], strides = [1, 1]} : vector<16x64xf32> to vector<1x64xf32>
    %164 = vector.broadcast %163 : vector<1x64xf32> to vector<8x64xf32>
    %165 = arith.mulf %162, %164 : vector<8x64xf32>
    %166 = vector.extract_strided_slice %0 {offsets = [14, 0], sizes = [1, 64], strides = [1, 1]} : vector<16x64xf32> to vector<1x64xf32>
    %167 = vector.broadcast %166 : vector<1x64xf32> to vector<8x64xf32>
    %168 = arith.addf %165, %167 : vector<8x64xf32>
    %cst_48 = arith.constant 0.000000e+00 : f32
    %169 = vector.broadcast %cst_48 : f32 to vector<8x64xf32>
    %170 = arith.maximumf %168, %169 : vector<8x64xf32>
    %c0_49 = arith.constant 0 : index
    %c512 = arith.constant 512 : index
    %171 = vector.load %arg3[%c0_49, %c512] : memref<64x640xbf16, #tpu.memory_space<vmem>>, vector<64x128xbf16>
    %172 = arith.truncf %170 : vector<8x64xf32> to vector<8x64xbf16>
    %cst_50 = arith.constant dense<0.000000e+00> : vector<8x128xf32>
    %173 = tpu.matmul %172, %171, %cst_50 {dimension_numbers = #tpu.dot_dimension_numbers<[1], [0], [0], [1], [0, 0, 1, 1], [], []>} : vector<8x64xbf16>, vector<64x128xbf16>, vector<8x128xf32> -> vector<8x128xf32>
    %c0_51 = arith.constant 0 : index
    %c0_52 = arith.constant 0 : index
    %174 = vector.load %arg5[%c0_51, %c0_52] : memref<1x128xf32, #tpu.memory_space<vmem>>, vector<1x128xf32>
    %175 = vector.broadcast %174 : vector<1x128xf32> to vector<8x128xf32>
    %176 = arith.addf %173, %175 : vector<8x128xf32>
    %cst_53 = arith.constant dense<0xFF800000> : vector<8xf32>
    %177 = vector.multi_reduction <maximumf>, %176, %cst_53 [1] : vector<8x128xf32> to vector<8xf32>
    %178 = vector.shape_cast %177 : vector<8xf32> to vector<8x1xf32>
    %179 = vector.broadcast %178 : vector<8x1xf32> to vector<8x128xf32>
    %180 = arith.subf %176, %179 : vector<8x128xf32>
    %181 = math.exp %180 : vector<8x128xf32>
    %cst_54 = arith.constant dense<0.000000e+00> : vector<8xf32>
    %182 = vector.multi_reduction <add>, %181, %cst_54 [1] : vector<8x128xf32> to vector<8xf32>
    %183 = vector.shape_cast %182 : vector<8xf32> to vector<8x1xf32>
    %184 = tpu.reciprocal %183 {approx = true} : vector<8x1xf32> -> vector<8x1xf32>
    %185 = vector.broadcast %184 : vector<8x1xf32> to vector<8x128xf32>
    %186 = arith.mulf %181, %185 : vector<8x128xf32>
    %c0_55 = arith.constant 0 : index
    %c0_56 = arith.constant 0 : index
    %187 = vector.load %arg6[%c0_55, %c0_56] : memref<8x128xf32, #tpu.memory_space<vmem>>, vector<8x128xf32>
    tpu.vector_store %arg6[%c0_55, %c0_56], %186 {strides = array<i32>} : memref<8x128xf32, #tpu.memory_space<vmem>>, vector<8x128xf32>,
    return
  }
  func.func @transform_0(%arg0: i32) -> (i32, i32) {
    %c0_i32 = arith.constant 0 : i32
    %c0_i32_0 = arith.constant 0 : i32
    return %arg0, %c0_i32 : i32, i32
  }
  func.func @transform_1(%arg0: i32) -> (i32, i32) {
    %c0_i32 = arith.constant 0 : i32
    %c0_i32_0 = arith.constant 0 : i32
    %c0_i32_1 = arith.constant 0 : i32
    return %c0_i32, %c0_i32_0 : i32, i32
  }
  func.func @transform_2(%arg0: i32) -> (i32, i32) {
    %c0_i32 = arith.constant 0 : i32
    %c0_i32_0 = arith.constant 0 : i32
    %c0_i32_1 = arith.constant 0 : i32
    return %c0_i32, %c0_i32_0 : i32, i32
  }
  func.func @transform_3(%arg0: i32) -> (i32, i32) {
    %c0_i32 = arith.constant 0 : i32
    %c0_i32_0 = arith.constant 0 : i32
    %c0_i32_1 = arith.constant 0 : i32
    return %c0_i32, %c0_i32_0 : i32, i32
  }
  func.func @transform_4(%arg0: i32) -> (i32, i32) {
    %c0_i32 = arith.constant 0 : i32
    %c0_i32_0 = arith.constant 0 : i32
    %c0_i32_1 = arith.constant 0 : i32
    return %c0_i32, %c0_i32_0 : i32, i32
  }
  func.func @transform_5(%arg0: i32) -> (i32, i32) {
    %c0_i32 = arith.constant 0 : i32
    %c0_i32_0 = arith.constant 0 : i32
    return %arg0, %c0_i32 : i32, i32
  }
}

</mosaic_0001>

<bundles_post_ra>
// kernel: tpu_custom_call.1
= control target key start
LH: loop header
LB: loop body
LE: loop exit
PB: predicated region body
PF: predicated region fallthrough
CT: control target
= control target key end

     0   :  { %10 = vsyncpa [#allocation3], 0  ;;  %s1188_s0 = inlined_call_operand.hbm [shape: bf16[8,8], index: 0, kind: input, shape index: {}]   ;;  %s1189_s1 = inlined_call_operand.hbm [shape: bf16[8,64], index: 1, kind: input, shape index: {}]   ;;  %s1190_s2 = inlined_call_operand.hbm [shape: bf16[64,640], index: 2, kind: input, shape index: {}]   ;;  %s1191_s3 = inlined_call_operand.hbm [shape: f32[16,64], index: 3, kind: input, shape index: {}]   ;;  %s1192_s4 = inlined_call_operand.vmem [shape: f32[1,128], index: 4, kind: input, shape index: {}]   ;;  %s1193_s5 = inlined_call_operand.hbm [shape: f32[8,128], index: 5, kind: output, shape index: {}]  }
   0x1   :  { %11 = vsyncpa [#allocation6], 0 }
   0x2   :  { %12 = vsyncpa [#allocation9], 0 }
   0x3   :  { %13 = vsyncpa [#allocation4], 0  ;;  %s979_s18 = smov [#allocation5]   ;;  %s980_s20 = smov [#allocation2]  }
   0x4   :  { %s30_s19 = sshll.u32 %s979_s18, 4  ;;  %s20_s21 = sshll.u32 %s980_s20, 4  ;;  %s31_s19 = int_to_ptr.vmem [resolvable:$true] %s30_s19  ;;  %s21_s21 = int_to_ptr.vmem [resolvable:$true] %s20_s21 }
   0x5   :  { %s861_s24 = scalar_lea.hbm %s1189_s1, 64 }
   0x6   :  { %p862_p0 = scmp.ne.s32.totalorder %s1189_s1, %s861_s24  ;;  %p865_p1 = scmp.lt.u32.totalorder %s861_s24, %s1189_s1 }
   0x8   :  { %p867_p2 = pnand %p865_p1, %p862_p0 }
   0xa   :  { %870 = shalt.err (!%p867_p2)
}
   0xb   :  { %s871_s29 = scalar_lea.vmem %s31_s19, 64  ;;  %p876_p4 = scmp.lt.s32.totalorder %s31_s19, %s31_s19 }
   0xc   :  { %p872_p3 = scmp.ne.s32.totalorder %s31_s19, %s871_s29  ;;  %p877_p5 = scmp.lt.s32.totalorder %s871_s29, %s871_s29 }
   0xe   :  { %p878_p6 = por %p877_p5, %p876_p4 }
  0x10   :  { %p879_p7 = pnand %p878_p6, %p872_p3 }
  0x12   :  { %882 = shalt.err (!%p879_p7)
}
  0x13   :  { %33 = dma.hbm_to_vmem [thread:$0]  %s1189_s1, 64, %s31_s19, [#allocation6]  }
  0x14   :  { %s883_s9 = scalar_lea.hbm %s1188_s0, 64 }
  0x15   :  { %p884_p8 = scmp.ne.s32.totalorder %s1188_s0, %s883_s9  ;;  %p887_p9 = scmp.lt.u32.totalorder %s883_s9, %s1188_s0 }
  0x17   :  { %p889_p10 = pnand %p887_p9, %p884_p8 }
  0x19   :  { %892 = shalt.err (!%p889_p10)
}
  0x1a   :  { %s893_s14 = scalar_lea.vmem %s21_s21, 64  ;;  %p898_p12 = scmp.lt.s32.totalorder %s21_s21, %s21_s21 }
  0x1b   :  { %p894_p11 = scmp.ne.s32.totalorder %s21_s21, %s893_s14  ;;  %p899_p13 = scmp.lt.s32.totalorder %s893_s14, %s893_s14 }
  0x1d   :  { %p900_p0 = por %p899_p13, %p898_p12 }
  0x1f   :  { %p901_p1 = pnand %p900_p0, %p894_p11 }
  0x21   :  { %904 = shalt.err (!%p901_p1)
}
  0x22   :  { %23 = dma.hbm_to_vmem [thread:$0]  %s1188_s0, 64, %s21_s21, [#allocation3]  }
  0x23   :  { %s981_s16 = smov [#allocation7]   ;;  %s905_s20 = scalar_lea.hbm %s1190_s2, 2560 }
  0x24   :  { %s39_s17 = sshll.u32 %s981_s16, 4  ;;  %p906_p2 = scmp.ne.s32.totalorder %s1190_s2, %s905_s20  ;;  %s40_s17 = int_to_ptr.vmem [resolvable:$true] %s39_s17 }
  0x25   :  { %p909_p3 = scmp.lt.u32.totalorder %s905_s20, %s1190_s2 }
  0x27   :  { %p911_p4 = pnand %p909_p3, %p906_p2 }
  0x29   :  { %914 = shalt.err (!%p911_p4)
}
  0x2a   :  { %s915_s26 = scalar_lea.vmem %s40_s17, 2560  ;;  %p920_p6 = scmp.lt.s32.totalorder %s40_s17, %s40_s17 }
  0x2b   :  { %p916_p5 = scmp.ne.s32.totalorder %s40_s17, %s915_s26  ;;  %p921_p7 = scmp.lt.s32.totalorder %s915_s26, %s915_s26 }
  0x2d   :  { %p922_p8 = por %p921_p7, %p920_p6 }
  0x2f   :  { %p923_p9 = pnand %p922_p8, %p916_p5 }
  0x31   :  { %926 = shalt.err (!%p923_p9)
}
  0x32   :  { %s982_s0 = smov 320   ;;  %s983_s21 = smov 20  }
  0x33   :  { %45 = dma.hbm_to_vmem [thread:$0]  %s1190_s2, 2560, %s40_s17, [#allocation6], %s982_s0, %s982_s0, %s983_s21  }
  0x34   :  { %s984_s29 = smov [#allocation8]   ;;  %s927_s8 = scalar_lea.hbm %s1191_s3, 256 }
  0x35   :  { %s51_s30 = sshll.u32 %s984_s29, 4  ;;  %p928_p10 = scmp.ne.s32.totalorder %s1191_s3, %s927_s8  ;;  %s52_s30 = int_to_ptr.vmem [resolvable:$true] %s51_s30 }
  0x36   :  { %p931_p11 = scmp.lt.u32.totalorder %s927_s8, %s1191_s3 }
  0x38   :  { %p933_p12 = pnand %p931_p11, %p928_p10 }
  0x3a   :  { %936 = shalt.err (!%p933_p12)
}
  0x3b   :  { %s937_s13 = scalar_lea.vmem %s52_s30, 256  ;;  %p942_p0 = scmp.lt.s32.totalorder %s52_s30, %s52_s30 }
  0x3c   :  { %p938_p13 = scmp.ne.s32.totalorder %s52_s30, %s937_s13  ;;  %p943_p1 = scmp.lt.s32.totalorder %s937_s13, %s937_s13 }
  0x3e   :  { %p944_p2 = por %p943_p1, %p942_p0 }
  0x40   :  { %p945_p3 = pnand %p944_p2, %p938_p13 }
  0x42   :  { %948 = shalt.err (!%p945_p3)
}
  0x43   :  { %s985_s2 = smov 128   ;;  %s986_s14 = smov 8  }
  0x44   :  { %57 = dma.hbm_to_vmem [thread:$0]  %s1191_s3, 256, %s52_s30, [#allocation9], %s985_s2, %s985_s2, %s986_s14  }
  0x45   :  { %971 = dma.done.wait [#allocation3], 64  }
  0x46   :  { %972 = vsyncadd [#allocation3], 4294967232 }
  0x47   :  { %973 = dma.done.wait [#allocation6], 2624  }
  0x48   :  { %974 = vsyncadd [#allocation6], 4294964672 }
  0x49   :  { %975 = dma.done.wait [#allocation9], 256  }
  0x4a   :  { %976 = vsyncadd [#allocation9], 4294967040  ;;  %v987_v0 = vmov 0.0   ;;  %vm988_vm0 = vmmov 0   ;;  %vm85_vm1 = vcmask 1043456   ;;  %vm81_vm2 = vcmask 64512  }
  0x4b   :  { %750 = vmatprep.subr.bf16.mxu0 %v987_v0  ;;  %752 = vmatprep.mubr.msk.bf16.mxu0 %vm988_vm0, %v987_v0  ;;  %v76_v1 = vld [vmem:[#allocation5] sm:$0xf]  ;;  %v75_v2 = vld [vmem:[#allocation2] sm:$0xf]  ;;  %v77_v4 = vlaneseq  ;;  %v1080_v7 = vld [vmem:[#allocation8] sm:$0xff]  ;;  %vm129_vm3 = vcmask 523264  }
  0x4c   :  { %756 = vmatprep.subr.bf16.mxu1 %v987_v0  ;;  %764 = vmatprep.mubr.msk.bf16.mxu1 %vm988_vm0, %v987_v0  ;;  %v87_v3 = vsel %vm85_vm1, %v76_v1, 0  ;;  %v827_v17 = vld [vmem:[#allocation7] ss:$20 sps:$4 sm:$0xff]   ;;  %v828_v18 = vld [vmem:[#allocation7 + $0x28] ss:$20 sps:$4 sm:$0xff]   ;;  %s989_s17 = smov [#allocation10]  }
  0x4d   :  { %751 = vmatpush3.bf16.msra.mxu0 %v87_v3  ;;  %v1077_v5 = vshrl.u32 %v77_v4, 7  ;;  %757 = vmatpush3.bf16.msra.mxu1 %v827_v17  ;;  %v829_v19 = vld [vmem:[#allocation7 + $0x50] ss:$20 sps:$4 sm:$0xff]   ;;  %v830_v20 = vld [vmem:[#allocation7 + $0x78] ss:$20 sps:$4 sm:$0xff]   ;;  %s685_s18 = sshll.u32 %s989_s17, 4  ;;  %s686_s18 = int_to_ptr.vmem [resolvable:$true] %s685_s18 }
  0x4e   :  { %768 = vmatprep.subr.bf16.mxu0 %v987_v0  ;;  %758 = vmatprep.subr.bf16.mxu1 %v987_v0  ;;  %v831_v50 = vld [vmem:[#allocation7 + $0x4] ss:$20 sps:$4 sm:$0xff]   ;;  %v832_v51 = vld [vmem:[#allocation7 + $0x2c] ss:$20 sps:$4 sm:$0xff]   ;;  %v833_v52 = vld [vmem:[#allocation7 + $0x54] ss:$20 sps:$4 sm:$0xff]   ;;  %p954_p5 = scmp.lt.s32.totalorder %s686_s18, %s686_s18 }
  0x4f   :  { %v79_v6 = vsub.s32 0, %v1077_v5  ;;  %v149_v29 = vsub.s32 1, %v1077_v5  ;;  %v154_v30 = vsub.s32 2, %v1077_v5  ;;  %v169_v40 = vsub.s32 3, %v1077_v5  ;;  %v834_v53 = vld [vmem:[#allocation7 + $0x7c] ss:$20 sps:$4 sm:$0xff]  }
  0x50   :  { %753 = vmatmul.mubr.msk.bf16.vlgmr.msra.gmra.mrb[0].mxu0 %vm81_vm2, %v75_v2  ;;  %v256_v62 = vsub.s32 4, %v1077_v5  ;;  %v261_v63 = vsub.s32 5, %v1077_v5 }
  0x51   :  { %776 = vmatprep.mubr.msk.bf16.mxu0 %vm988_vm0, %v987_v0  ;;  %v80_v8 = vrot.slane %v1080_v7, %v79_v6  ;;  %759 = vmatpush3.bf16.msra.mxu1 %v828_v18  ;;  %v150_v32 = vrot.slane %v1080_v7, %v149_v29  ;;  %v155_v35 = vrot.slane %v1080_v7, %v154_v30 }
  0x52   :  { %760 = vmatprep.subr.bf16.mxu1 %v987_v0  ;;  %v170_v41 = vrot.slane %v1080_v7, %v169_v40  ;;  %769 = vmatpush3.bf16.msra.mxu0 %v831_v50  ;;  %v257_v2 = vrot.slane %v1080_v7, %v256_v62 }
  0x53   :  { %770 = vmatprep.subr.bf16.mxu0 %v987_v0 }
  0x55   :  { %761 = vmatpush3.bf16.msra.mxu1 %v829_v19 }
  0x56   :  { %762 = vmatprep.subr.bf16.mxu1 %v987_v0  ;;  %771 = vmatpush3.bf16.msra.mxu0 %v832_v51 }
  0x57   :  { %772 = vmatprep.subr.bf16.mxu0 %v987_v0 }
  0x59   :  { %763 = vmatpush3.bf16.msra.mxu1 %v830_v20 }
  0x5a   :  { %780 = vmatprep.subr.bf16.mxu1 %v987_v0  ;;  %773 = vmatpush3.bf16.msra.mxu0 %v833_v52 }
  0x5b   :  { %774 = vmatprep.subr.bf16.mxu0 %v987_v0 }
  0x5e   :  { %775 = vmatpush3.bf16.msra.mxu0 %v834_v53 }
  0x5f   :  { %792 = vmatprep.subr.bf16.mxu0 %v987_v0 }
 0x123   :  { %v123_v9 = vpop.f32.mrb[0].mxu0 }
 0x124   :  { %v124_v10 = vadd.f32 %v123_v9, %v80_v8  ;;  %v754_v11 = vpop.f32.mrb[1].mxu0  ;;  %v262_v8 = vrot.slane %v1080_v7, %v261_v63 }
 0x125   :  { %v126_v12 = vpop.f32.mrb[2].mxu0 }
 0x126   :  { %v755_v13 = vpop.f32.mrb[3].mxu0  ;;  %v130_v14 = vsel %vm129_vm3, %v124_v10, 0.0  ;;  %v135_v15 = vmul.f32 %v124_v10, %v124_v10 }
 0x127   :  { %131 = vadd.xlane.f32.xlu0 %v130_v14  ;;  %v276_v13 = vsub.s32 6, %v1077_v5 }
 0x128   :  { %v136_v16 = vsel %vm129_vm3, %v135_v15, 0.0 }
 0x129   :  { %v277_v14 = vrot.slane %v1080_v7, %v276_v13 }
 0x12b   :  { %137 = vadd.xlane.f32.xlu0 %v136_v16 }
 0x1b4   :  { %v132_v21 = vpop.xlane.xlu0 %131 }
 0x1b5   :  { %v134_v22 = vmul.f32 0.015625, %v132_v21 }
 0x1b7   :  { %v140_v24 = vmul.f32 %v134_v22, %v134_v22  ;;  %v143_v31 = vsub.f32 %v124_v10, %v134_v22 }
 0x1b8   :  { %v138_v23 = vpop.xlane.xlu0 %137 }
 0x1b9   :  { %v139_v25 = vmul.f32 0.015625, %v138_v23  ;;  %v835_v23 = vld [vmem:[#allocation7 + $0x8] ss:$20 sps:$4 sm:$0xff]  }
 0x1bb   :  { %v141_v26 = vsub.f32 %v139_v25, %v140_v24  ;;  %v836_v24 = vld [vmem:[#allocation7 + $0x30] ss:$20 sps:$4 sm:$0xff]   ;;  %v837_v25 = vld [vmem:[#allocation7 + $0x58] ss:$20 sps:$4 sm:$0xff]  }
 0x1bd   :  { %v142_v27 = vmax.f32 %v141_v26, 0.0  ;;  %v838_v26 = vld [vmem:[#allocation7 + $0x80] ss:$20 sps:$4 sm:$0xff]  }
 0x1bf   :  { %v144_v28 = vadd.f32 1e-05, %v142_v27 }
 0x1c1   :  { %847 = vrsqrt.f32 %v144_v28 }
 0x1cb   :  { %v848_v33 = vpop.eup %847 }
 0x1cc   :  { %v146_v34 = vmul.f32 %v848_v33, %v143_v31 }
 0x1ce   :  { %v151_v36 = vmul.f32 %v150_v32, %v146_v34 }
 0x1d0   :  { %v156_v37 = vadd.f32 %v155_v35, %v151_v36 }
 0x1d2   :  { %v157_v38 = vmax.f32 %v156_v37, 0.0  ;;  %v363_v37 = vsub.s32 7, %v1077_v5 }
 0x1d4   :  { %v166_v39 = vpack.c.bf16 %v157_v38, %v157_v38  ;;  %v1134_v38 = vld [vmem:[#allocation8 + $0x8] sm:$0xff] }
 0x1d6   :  { %765 = vmatmul.mubr.msk.bf16.vlgmr.msra.gmra.mrb[0].mxu1 %vm129_vm3, %v166_v39 }
 0x1d7   :  { %788 = vmatprep.mubr.msk.bf16.mxu1 %vm988_vm0, %v987_v0  ;;  %781 = vmatpush3.bf16.msra.mxu1 %v835_v23 }
 0x1d8   :  { %782 = vmatprep.subr.bf16.mxu1 %v987_v0 }
 0x1db   :  { %783 = vmatpush3.bf16.msra.mxu1 %v836_v24 }
 0x1dc   :  { %784 = vmatprep.subr.bf16.mxu1 %v987_v0 }
 0x1df   :  { %785 = vmatpush3.bf16.msra.mxu1 %v837_v25 }
 0x1e0   :  { %786 = vmatprep.subr.bf16.mxu1 %v987_v0 }
 0x1e3   :  { %787 = vmatpush3.bf16.msra.mxu1 %v838_v26  ;;  %v843_v26 = vld [vmem:[#allocation7 + $0x10] ss:$20 sps:$4 sm:$0xff]  }
 0x1e4   :  { %804 = vmatprep.subr.bf16.mxu1 %v987_v0 }
 0x2a9   :  { %v232_v42 = vpop.f32.mrb[0].mxu1 }
 0x2aa   :  { %v233_v43 = vadd.f32 %v232_v42, %v170_v41  ;;  %v766_v44 = vpop.f32.mrb[1].mxu1  ;;  %v364_v41 = vrot.slane %v1080_v7, %v363_v37 }
 0x2ab   :  { %v235_v45 = vpop.f32.mrb[2].mxu1 }
 0x2ac   :  { %v767_v46 = vpop.f32.mrb[3].mxu1  ;;  %v238_v47 = vsel %vm129_vm3, %v233_v43, 0.0  ;;  %v242_v48 = vmul.f32 %v233_v43, %v233_v43 }
 0x2ad   :  { %239 = vadd.xlane.f32.xlu1 %v238_v47 }
 0x2ae   :  { %v243_v49 = vsel %vm129_vm3, %v242_v48, 0.0 }
 0x2b1   :  { %244 = vadd.xlane.f32.xlu1 %v243_v49  ;;  %v384_v49 = vrot.slane %v1134_v38, %v149_v29  ;;  %v841_v29 = vld [vmem:[#allocation7 + $0x5c] ss:$20 sps:$4 sm:$0xff]  }
 0x33a   :  { %v240_v54 = vpop.xlane.xlu1 %239 }
 0x33b   :  { %v241_v55 = vmul.f32 0.015625, %v240_v54 }
 0x33d   :  { %v247_v57 = vmul.f32 %v241_v55, %v241_v55  ;;  %v250_v1 = vsub.f32 %v233_v43, %v241_v55  ;;  %v369_v43 = vrot.slane %v1134_v38, %v79_v6 }
 0x33e   :  { %v245_v56 = vpop.xlane.xlu1 %244 }
 0x33f   :  { %v246_v58 = vmul.f32 0.015625, %v245_v56  ;;  %v839_v56 = vld [vmem:[#allocation7 + $0xc] ss:$20 sps:$4 sm:$0xff]  }
 0x341   :  { %v248_v59 = vsub.f32 %v246_v58, %v247_v57  ;;  %v840_v57 = vld [vmem:[#allocation7 + $0x34] ss:$20 sps:$4 sm:$0xff]   ;;  %v842_v58 = vld [vmem:[#allocation7 + $0x84] ss:$20 sps:$4 sm:$0xff]  }
 0x343   :  { %v249_v60 = vmax.f32 %v248_v59, 0.0 }
 0x345   :  { %v251_v61 = vadd.f32 1e-05, %v249_v60 }
 0x347   :  { %849 = vrsqrt.f32 %v251_v61 }
 0x351   :  { %v850_v3 = vpop.eup %849 }
 0x352   :  { %v253_v4 = vmul.f32 %v850_v3, %v250_v1 }
 0x354   :  { %v258_v9 = vmul.f32 %v257_v2, %v253_v4 }
 0x356   :  { %v263_v10 = vadd.f32 %v262_v8, %v258_v9  ;;  %v471_v9 = vrot.slane %v1134_v38, %v154_v30 }
 0x358   :  { %v264_v11 = vmax.f32 %v263_v10, 0.0 }
 0x35a   :  { %v273_v12 = vpack.c.bf16 %v264_v11, %v264_v11 }
 0x35c   :  { %777 = vmatmul.mubr.msk.bf16.vlgmr.msra.gmra.mrb[4].mxu0 %vm129_vm3, %v273_v12  ;;  %v476_v12 = vrot.slane %v1134_v38, %v169_v40 }
 0x35d   :  { %800 = vmatprep.mubr.msk.bf16.mxu0 %vm988_vm0, %v987_v0  ;;  %793 = vmatpush3.bf16.msra.mxu0 %v839_v56 }
 0x35e   :  { %794 = vmatprep.subr.bf16.mxu0 %v987_v0 }
 0x361   :  { %795 = vmatpush3.bf16.msra.mxu0 %v840_v57 }
 0x362   :  { %796 = vmatprep.subr.bf16.mxu0 %v987_v0 }
 0x365   :  { %797 = vmatpush3.bf16.msra.mxu0 %v841_v29 }
 0x366   :  { %798 = vmatprep.subr.bf16.mxu0 %v987_v0 }
 0x369   :  { %799 = vmatpush3.bf16.msra.mxu0 %v842_v58 }
 0x42f   :  { %v339_v15 = vpop.f32.mrb[4].mxu0 }
 0x430   :  { %v340_v16 = vadd.f32 %v339_v15, %v277_v14  ;;  %v778_v17 = vpop.f32.mrb[5].mxu0 }
 0x431   :  { %v342_v18 = vpop.f32.mrb[6].mxu0 }
 0x432   :  { %v779_v19 = vpop.f32.mrb[7].mxu0  ;;  %v345_v20 = vsel %vm129_vm3, %v340_v16, 0.0  ;;  %v349_v21 = vmul.f32 %v340_v16, %v340_v16 }
 0x433   :  { %346 = vadd.xlane.f32.xlu0 %v345_v20  ;;  %v491_v19 = vrot.slane %v1134_v38, %v256_v62  ;;  %v845_v62 = vld [vmem:[#allocation7 + $0x60] ss:$20 sps:$4 sm:$0xff]  }
 0x434   :  { %v350_v22 = vsel %vm129_vm3, %v349_v21, 0.0 }
 0x435   :  { %351 = vadd.xlane.f32.xlu1 %v350_v22 }
 0x4c0   :  { %v347_v27 = vpop.xlane.xlu0 %346 }
 0x4c1   :  { %v348_v28 = vmul.f32 0.015625, %v347_v27  ;;  %v844_v27 = vld [vmem:[#allocation7 + $0x38] ss:$20 sps:$4 sm:$0xff]  }
 0x4c2   :  { %v352_v31 = vpop.xlane.xlu1 %351 }
 0x4c3   :  { %v354_v32 = vmul.f32 %v348_v28, %v348_v28  ;;  %v353_v33 = vmul.f32 0.015625, %v352_v31  ;;  %v357_v39 = vsub.f32 %v340_v16, %v348_v28  ;;  %v846_v28 = vld [vmem:[#allocation7 + $0x88] ss:$20 sps:$4 sm:$0xff]  }
 0x4c5   :  { %v355_v34 = vsub.f32 %v353_v33, %v354_v32 }
 0x4c7   :  { %v356_v35 = vmax.f32 %v355_v34, 0.0 }
 0x4c9   :  { %v358_v36 = vadd.f32 1e-05, %v356_v35 }
 0x4cb   :  { %851 = vrsqrt.f32 %v358_v36 }
 0x4d5   :  { %v852_v42 = vpop.eup %851 }
 0x4d6   :  { %v360_v44 = vmul.f32 %v852_v42, %v357_v39  ;;  %v578_v42 = vrot.slane %v1134_v38, %v261_v63 }
 0x4d8   :  { %v365_v45 = vmul.f32 %v364_v41, %v360_v44 }
 0x4da   :  { %v370_v46 = vadd.f32 %v369_v43, %v365_v45 }
 0x4dc   :  { %v371_v47 = vmax.f32 %v370_v46, 0.0 }
 0x4de   :  { %v380_v48 = vpack.c.bf16 %v371_v47, %v371_v47 }
 0x4e0   :  { %789 = vmatmul.mubr.msk.bf16.vlgmr.msra.gmra.mrb[4].mxu1 %vm129_vm3, %v380_v48 }
 0x4e1   :  { %812 = vmatprep.mubr.msk.bf16.mxu1 %vm988_vm0, %v987_v0  ;;  %805 = vmatpush3.bf16.msra.mxu1 %v843_v26 }
 0x4e2   :  { %806 = vmatprep.subr.bf16.mxu1 %v987_v0 }
 0x4e5   :  { %807 = vmatpush3.bf16.msra.mxu1 %v844_v27 }
 0x4e6   :  { %808 = vmatprep.subr.bf16.mxu1 %v987_v0 }
 0x4e9   :  { %809 = vmatpush3.bf16.msra.mxu1 %v845_v62 }
 0x4ea   :  { %810 = vmatprep.subr.bf16.mxu1 %v987_v0  ;;  %v583_v0 = vrot.slane %v1134_v38, %v276_v13 }
 0x4ed   :  { %811 = vmatpush3.bf16.msra.mxu1 %v846_v28 }
 0x5b3   :  { %v446_v7 = vpop.f32.mrb[4].mxu1 }
 0x5b4   :  { %v447_v50 = vadd.f32 %v446_v7, %v384_v49  ;;  %v790_v51 = vpop.f32.mrb[5].mxu1  ;;  %v717_v49 = vld [vmem:[%s1192_s4] ss:$0 sm:$0xff]  ;;  %s949_s4 = scalar_lea.vmem %s686_s18, 128 }
 0x5b5   :  { %v449_v52 = vpop.f32.mrb[6].mxu1  ;;  %p950_p4 = scmp.ne.s32.totalorder %s686_s18, %s949_s4  ;;  %p955_p6 = scmp.lt.s32.totalorder %s949_s4, %s949_s4 }
 0x5b6   :  { %v791_v53 = vpop.f32.mrb[7].mxu1  ;;  %v452_v6 = vsel %vm129_vm3, %v447_v50, 0.0  ;;  %v456_v54 = vmul.f32 %v447_v50, %v447_v50 }
 0x5b7   :  { %453 = vadd.xlane.f32.xlu0 %v452_v6  ;;  %p956_p7 = por %p955_p6, %p954_p5 }
 0x5b8   :  { %v457_v55 = vsel %vm129_vm3, %v456_v54, 0.0 }
 0x5b9   :  { %458 = vadd.xlane.f32.xlu1 %v457_v55  ;;  %p957_p8 = pnand %p956_p7, %p950_p4 }
 0x644   :  { %v454_v59 = vpop.xlane.xlu0 %453 }
 0x645   :  { %v455_v60 = vmul.f32 0.015625, %v454_v59 }
 0x646   :  { %v459_v61 = vpop.xlane.xlu1 %458 }
 0x647   :  { %v461_v1 = vmul.f32 %v455_v60, %v455_v60  ;;  %v460_v2 = vmul.f32 0.015625, %v459_v61  ;;  %v464_v10 = vsub.f32 %v447_v50, %v455_v60 }
 0x649   :  { %v462_v3 = vsub.f32 %v460_v2, %v461_v1 }
 0x64b   :  { %v463_v4 = vmax.f32 %v462_v3, 0.0 }
 0x64d   :  { %v465_v8 = vadd.f32 1e-05, %v463_v4 }
 0x64f   :  { %853 = vrsqrt.f32 %v465_v8 }
 0x659   :  { %v854_v11 = vpop.eup %853 }
 0x65a   :  { %v467_v14 = vmul.f32 %v854_v11, %v464_v10 }
 0x65c   :  { %v472_v15 = vmul.f32 %v471_v9, %v467_v14 }
 0x65e   :  { %v477_v16 = vadd.f32 %v476_v12, %v472_v15 }
 0x660   :  { %v478_v17 = vmax.f32 %v477_v16, 0.0 }
 0x662   :  { %v487_v18 = vpack.c.bf16 %v478_v17, %v478_v17 }
 0x664   :  { %801 = vmatmul.mubr.msk.bf16.vlgmr.msra.gmra.mrb[8].mxu0 %vm129_vm3, %v487_v18 }
 0x737   :  { %v553_v20 = vpop.f32.mrb[8].mxu0 }
 0x738   :  { %v554_v21 = vadd.f32 %v553_v20, %v491_v19  ;;  %v802_v30 = vpop.f32.mrb[9].mxu0 }
 0x739   :  { %v556_v22 = vpop.f32.mrb[10].mxu0 }
 0x73a   :  { %v803_v23 = vpop.f32.mrb[11].mxu0  ;;  %v559_v24 = vsel %vm129_vm3, %v554_v21, 0.0  ;;  %v563_v25 = vmul.f32 %v554_v21, %v554_v21 }
 0x73b   :  { %560 = vadd.xlane.f32.xlu0 %v559_v24 }
 0x73c   :  { %v564_v40 = vsel %vm129_vm3, %v563_v25, 0.0 }
 0x73d   :  { %565 = vadd.xlane.f32.xlu1 %v564_v40 }
 0x7c8   :  { %v561_v31 = vpop.xlane.xlu0 %560 }
 0x7c9   :  { %v562_v32 = vmul.f32 0.03125, %v561_v31 }
 0x7ca   :  { %v566_v33 = vpop.xlane.xlu1 %565 }
 0x7cb   :  { %v568_v34 = vmul.f32 %v562_v32, %v562_v32  ;;  %v567_v35 = vmul.f32 0.03125, %v566_v33  ;;  %v571_v41 = vsub.f32 %v554_v21, %v562_v32 }
 0x7cd   :  { %v569_v36 = vsub.f32 %v567_v35, %v568_v34 }
 0x7cf   :  { %v570_v37 = vmax.f32 %v569_v36, 0.0 }
 0x7d1   :  { %v572_v39 = vadd.f32 1e-05, %v570_v37 }
 0x7d3   :  { %855 = vrsqrt.f32 %v572_v39 }
 0x7dd   :  { %v856_v43 = vpop.eup %855 }
 0x7de   :  { %v574_v44 = vmul.f32 %v856_v43, %v571_v41 }
 0x7e0   :  { %v579_v45 = vmul.f32 %v578_v42, %v574_v44 }
 0x7e2   :  { %v584_v46 = vadd.f32 %v583_v0, %v579_v45 }
 0x7e4   :  { %v585_v47 = vmax.f32 %v584_v46, 0.0 }
 0x7e6   :  { %v594_v48 = vpack.c.bf16 %v585_v47, %v585_v47 }
 0x7e8   :  { %813 = vmatmul.mubr.msk.bf16.vlgmr.msra.gmra.mrb[8].mxu1 %vm129_vm3, %v594_v48 }
 0x8bb   :  { %v663_v7 = vpop.f32.mrb[8].mxu1 }
 0x8bc   :  { %v664_v50 = vadd.f32 %v717_v49, %v663_v7  ;;  %v814_v51 = vpop.f32.mrb[9].mxu1 }
 0x8bd   :  { %v666_v63 = vpop.f32.mrb[10].mxu1 }
 0x8be   :  { %669 = vmax.xlane.f32.xlu0 %v664_v50  ;;  %v815_v52 = vpop.f32.mrb[11].mxu1 }
 0x94b   :  { %v670_v5 = vpop.xlane.xlu0 %669 }
 0x94c   :  { %v671_v53 = vsub.f32 %v664_v50, %v670_v5 }
 0x94e   :  { %v672_v13 = vmul.f32 1.442695, %v671_v53 }
 0x950   :  { %857 = vpow2.f32 %v672_v13 }
 0x95a   :  { %v858_v38 = vpop.eup %857 }
 0x95b   :  { %674 = vadd.xlane.f32.xlu1 %v858_v38 }
 0x9e8   :  { %v675_v6 = vpop.xlane.xlu1 %674 }
 0x9e9   :  { %859 = vrcp.f32 %v675_v6 }
 0x9f3   :  { %v860_v54 = vpop.eup %859 }
 0x9f4   :  { %v677_v55 = vmul.f32 %v860_v54, %v858_v38 }
 0x9f6   :  { %678 = vst [vmem:[#allocation10] sm:$0xff] %v677_v55 }
 0x9f7   :  { %960 = shalt.err (!%p957_p8)
}
 0x9f8   :  { %s961_s22 = scalar_lea.hbm %s1193_s5, 128 }
 0x9f9   :  { %p962_p9 = scmp.ne.s32.totalorder %s1193_s5, %s961_s22  ;;  %p965_p10 = scmp.lt.u32.totalorder %s961_s22, %s1193_s5 }
 0x9fb   :  { %p967_p11 = pnand %p965_p10, %p962_p9 }
 0x9fd   :  { %970 = shalt.err (!%p967_p11)
}
 0x9fe   :  { %688 = dma.vmem_to_hbm [thread:$0]  %s686_s18, 128, %s1193_s5, [#allocation4]  }
 0x9ff   :  { %977 = dma.done.wait [#allocation4], 128  }
 0xa00   :  { %978 = vsyncadd [#allocation4], 4294967168 }
 0xa01   :  { %692 = vsyncpa [#allocation3], 1 }
 0xa02   :  { %693 = vsyncpa [#allocation6], 1 }
 0xa03   :  { %694 = vsyncpa [#allocation9], 1 }
 0xa04   :  { %695 = vsyncpa [#allocation4], 1 }

</bundles_post_ra>
